<compile_context>
chip_gen: v7x
topology: tpu7x:2x2x1
jax: 0.10.0
libtpu: 0.0.40
codegen_flags: <defaults>
</compile_context>

<pallas_src>
import functools

import jax
import jax.numpy as jnp
from jax.experimental import pallas as pl
from jax.experimental.pallas import tpu as pltpu


# ------------------------------ kernel bodies ------------------------------
def _matgru_step(w_z, u_ur, u_h, b_ur, b_h, z32, q32, rows):
    """One MatGRUCell step on VMEM-resident tiles.

    w_z  : (3r, r) bf16  -- [Wu; Wr; Wh], all multiplied against z only
    u_ur : (2r, r) bf16  -- [Uu; Ur]
    u_h  : ( r, r) bf16  -- Uh
    b_ur : (2r, c) f32   -- [bu; br]
    b_h  : ( r, c) f32
    z32, q32 : (r, c) f32 activations
    """
    z16 = z32.astype(jnp.bfloat16)
    q16 = q32.astype(jnp.bfloat16)

    # MXU call 1: every W-side pre-activation shares the z operand.
    pre_z = jnp.dot(w_z, z16, preferred_element_type=jnp.float32)        # (3r, c)

    # MXU call 2: U-side of the update/reset gates (accumulated in f32).
    pre_ur = (pre_z[:2 * rows]
              + jnp.dot(u_ur, q16, preferred_element_type=jnp.float32)
              + b_ur)                                                     # (2r, c)
    update = jax.nn.sigmoid(pre_ur[:rows])
    reset = jax.nn.sigmoid(pre_ur[rows:])

    # MXU call 3: only Uh @ (reset*Q) depends on reset; K = r (was 2r).
    h_in = (reset * q32).astype(jnp.bfloat16)
    pre_h = (pre_z[2 * rows:]
             + jnp.dot(u_h, h_in, preferred_element_type=jnp.float32)
             + b_h)                                                       # (r, c)
    htilda = jnp.tanh(pre_h)

    # Blend in f32: new_Q = (1 - u) * Q + u * htilda
    return (1.0 - update) * q32 + update * htilda


def _matgru_cell_kernel(w_z_ref, u_ur_ref, u_h_ref, b_ur_ref, b_h_ref,
                        z_ref, q_ref, o_ref, *, rows):
    new_q = _matgru_step(
        w_z_ref[...], u_ur_ref[...], u_h_ref[...],
        b_ur_ref[...], b_h_ref[...],
        z_ref[...].astype(jnp.float32), q_ref[...].astype(jnp.float32), rows)
    o_ref[...] = new_q.astype(o_ref.dtype)


def _matgru_seq_kernel(w_z_ref, u_ur_ref, u_h_ref, b_ur_ref, b_h_ref,
                       z_ref, q0_ref, o_ref, q_scr, *, rows):
    t = pl.program_id(0)

    # Initialize the carried state (f32) from prev_Q at the first step only.
    @pl.when(t == 0)
    def _():
        q_scr[...] = q0_ref[...].astype(jnp.float32)

    new_q = _matgru_step(
        w_z_ref[...], u_ur_ref[...], u_h_ref[...],
        b_ur_ref[...], b_h_ref[...],
        z_ref[0].astype(jnp.float32), q_scr[...], rows)
    q_scr[...] = new_q

    # Output block index is constant -> stays VMEM-resident; only write the
    # final state (single HBM writeback at the end of the grid).
    @pl.when(t == pl.num_programs(0) - 1)
    def _():
        o_ref[...] = new_q.astype(o_ref.dtype)


# ------------------------------ host wrappers ------------------------------
def pack_mat_gru_cell_params(params, weight_dtype=jnp.bfloat16):
    """Pack per-gate weights once (outside any time loop).

    Weights are split along K (no in-kernel activation concat needed) and cast
    to bf16 for the native MXU path; biases stay f32 (added post-accumulate).
    """
    w_z = jnp.concatenate(
        [params["Wu"], params["Wr"], params["Wh"]], axis=0).astype(weight_dtype)
    u_ur = jnp.concatenate(
        [params["Uu"], params["Ur"]], axis=0).astype(weight_dtype)
    u_h = params["Uh"].astype(weight_dtype)
    b_ur = jnp.concatenate(
        [params["bu"], params["br"]], axis=0).astype(jnp.float32)
    b_h = params["bh"].astype(jnp.float32)
    return w_z, u_ur, u_h, b_ur, b_h


def _check_shapes(packed, rows, cols):
    w_z, u_ur, u_h, b_ur, b_h = packed
    assert w_z.shape == (3 * rows, rows)
    assert u_ur.shape == (2 * rows, rows)
    assert u_h.shape == (rows, rows)
    assert b_ur.shape == (2 * rows, cols)
    assert b_h.shape == (rows, cols)
    # Keep gate splits on sublane boundaries and stores lane-dense; pad at
    # pack time if a model violates this instead of relying on exemptions.
    assert rows % 8 == 0, "pad rows to a multiple of 8 at pack time"
    assert cols % 128 == 0, "pad cols to a multiple of 128 at pack time"


def mat_gru_cell(packed_params, prev_Q, z_topk=None):
    """Single-step MatGRUCell.forward as one fused Pallas call."""
    if z_topk is None:
        z_topk = prev_Q
    rows, cols = prev_Q.shape
    assert z_topk.shape == (rows, cols)
    _check_shapes(packed_params, rows, cols)

    kernel = functools.partial(_matgru_cell_kernel, rows=rows)
    # Tiny operands: fully VMEM-resident, single grid point.
    full_vmem = pl.BlockSpec(memory_space=pltpu.MemorySpace.VMEM)

    return pl.pallas_call(
        kernel,
        out_shape=jax.ShapeDtypeStruct((rows, cols), prev_Q.dtype),
        in_specs=[full_vmem] * 7,
        out_specs=full_vmem,
        compiler_params=pltpu.CompilerParams(
            vmem_limit_bytes=32 * 1024 * 1024),
    )(*packed_params, z_topk, prev_Q)


def mat_gru_cell_seq(packed_params, prev_Q, z_seq):
    """Fused T-step recurrence: Q_{t+1} = cell(Q_t, z_seq[t]).

    grid=(T,), weights/biases DMA'd once (constant index_map) and kept
    VMEM-resident; Q carried across steps in an f32 VMEM scratch.
    """
    rows, cols = prev_Q.shape
    T = z_seq.shape[0]
    assert z_seq.shape == (T, rows, cols)
    _check_shapes(packed_params, rows, cols)

    kernel = functools.partial(_matgru_seq_kernel, rows=rows)
    const = lambda t: (0, 0)

    grid_spec = pltpu.PrefetchScalarGridSpec(
        num_scalar_prefetch=0,
        grid=(T,),
        in_specs=[
            pl.BlockSpec((3 * rows, rows), const),      # w_z   (resident)
            pl.BlockSpec((2 * rows, rows), const),      # u_ur  (resident)
            pl.BlockSpec((rows, rows), const),          # u_h   (resident)
            pl.BlockSpec((2 * rows, cols), const),      # b_ur  (resident)
            pl.BlockSpec((rows, cols), const),          # b_h   (resident)
            pl.BlockSpec((1, rows, cols), lambda t: (t, 0, 0)),  # z_seq[t]
            pl.BlockSpec((rows, cols), const),          # prev_Q (read at t=0)
        ],
        out_specs=pl.BlockSpec((rows, cols), const),    # final Q (resident)
        scratch_shapes=[pltpu.VMEM((rows, cols), jnp.float32)],
    )

    return pl.pallas_call(
        kernel,
        out_shape=jax.ShapeDtypeStruct((rows, cols), prev_Q.dtype),
        grid_spec=grid_spec,
        compiler_params=pltpu.CompilerParams(
            dimension_semantics=("arbitrary",),
            vmem_limit_bytes=32 * 1024 * 1024),
    )(*packed_params, z_seq, prev_Q)


# ----------------------------- pure-JAX reference -----------------------------
def _gate_ref(W, U, b, x, h, act):
    pre = W @ x + U @ h + b
    return jax.nn.sigmoid(pre) if act == "sigmoid" else jnp.tanh(pre)


def _cell_ref(p, prev_Q, z_topk):
    update = _gate_ref(p["Wu"], p["Uu"], p["bu"], z_topk, prev_Q, "sigmoid")
    reset = _gate_ref(p["Wr"], p["Ur"], p["br"], z_topk, prev_Q, "sigmoid")
    h_cap = reset * prev_Q
    h_cap = _gate_ref(p["Wh"], p["Uh"], p["bh"], z_topk, h_cap, "tanh")
    return (1.0 - update) * prev_Q + update * h_cap


def _xavier_uniform(key, shape, dtype=jnp.float32):
    # Matches torch.nn.init.xavier_uniform_ (gain=1).
    fan_in, fan_out = shape[1], shape[0]
    bound = (6.0 / (fan_in + fan_out)) ** 0.5
    return jax.random.uniform(key, shape, dtype=dtype, minval=-bound, maxval=bound)


if __name__ == "__main__":
    # rows = in_feats, cols = out_feats (prev_Q is a GCN weight matrix).
    in_feats, out_feats, T = 32, 128, 4

    key = jax.random.PRNGKey(0)
    keys = jax.random.split(key, 12)

    params = {
        "Wu": _xavier_uniform(keys[0], (in_feats, in_feats)),
        "Uu": _xavier_uniform(keys[1], (in_feats, in_feats)),
        "bu": 0.1 * jax.random.normal(keys[2], (in_feats, out_feats), jnp.float32),
        "Wr": _xavier_uniform(keys[3], (in_feats, in_feats)),
        "Ur": _xavier_uniform(keys[4], (in_feats, in_feats)),
        "br": 0.1 * jax.random.normal(keys[5], (in_feats, out_feats), jnp.float32),
        "Wh": _xavier_uniform(keys[6], (in_feats, in_feats)),
        "Uh": _xavier_uniform(keys[7], (in_feats, in_feats)),
        "bh": 0.1 * jax.random.normal(keys[8], (in_feats, out_feats), jnp.float32),
    }
    prev_Q = jax.random.normal(keys[9], (in_feats, out_feats), jnp.float32)
    z_topk = jax.random.normal(keys[10], (in_feats, out_feats), jnp.float32)
    z_seq = jax.random.normal(keys[11], (T, in_feats, out_feats), jnp.float32)

    packed = pack_mat_gru_cell_params(params)

    # 1) Single-step forward with explicit z_topk (module semantics).
    new_Q = jax.block_until_ready(mat_gru_cell(packed, prev_Q, z_topk))
    ref = _cell_ref(params, prev_Q, z_topk)
    assert new_Q.shape == (in_feats, out_feats)
    err = float(jnp.max(jnp.abs(new_Q - ref)))
    assert err < 5e-2, f"single-step mismatch: max |err| = {err}"

    # 2) z_topk=None default path (z_topk := prev_Q).
    new_Q2 = jax.block_until_ready(mat_gru_cell(packed, prev_Q))
    ref2 = _cell_ref(params, prev_Q, prev_Q)
    err2 = float(jnp.max(jnp.abs(new_Q2 - ref2)))
    assert err2 < 5e-2, f"default-z mismatch: max |err| = {err2}"

    # 3) Fused T-step recurrence (weights resident across the whole loop).
    new_QT = jax.block_until_ready(mat_gru_cell_seq(packed, prev_Q, z_seq))
    refT = prev_Q
    for t in range(T):
        refT = _cell_ref(params, refT, z_seq[t])
    errT = float(jnp.max(jnp.abs(new_QT - refT)))
    assert new_QT.shape == (in_feats, out_feats)
    assert errT < 1e-1, f"seq mismatch: max |err| = {errT}"

    print("KERNEL_OK")
</pallas_src>

<mosaic_0001>
module attributes {stable_mosaic.version = 11 : i64} {
  func.func @_matgru_cell_kernel(%arg0: memref<96x32xbf16, #tpu.memory_space<vmem>>, %arg1: memref<64x32xbf16, #tpu.memory_space<vmem>>, %arg2: memref<32x32xbf16, #tpu.memory_space<vmem>>, %arg3: memref<64x128xf32, #tpu.memory_space<vmem>>, %arg4: memref<32x128xf32, #tpu.memory_space<vmem>>, %arg5: memref<32x128xf32, #tpu.memory_space<vmem>>, %arg6: memref<32x128xf32, #tpu.memory_space<vmem>>, %arg7: memref<32x128xf32, #tpu.memory_space<vmem>>) attributes {dimension_semantics = [], scalar_prefetch = 0 : i64, scratch_operands = 0 : i64, tpu.core_type = #tpu.core_type<tc>} {
    %c0 = arith.constant 0 : index
    %c0_0 = arith.constant 0 : index
    %0 = vector.load %arg0[%c0, %c0_0] : memref<96x32xbf16, #tpu.memory_space<vmem>>, vector<96x32xbf16>
    %c0_1 = arith.constant 0 : index
    %c0_2 = arith.constant 0 : index
    %1 = vector.load %arg1[%c0_1, %c0_2] : memref<64x32xbf16, #tpu.memory_space<vmem>>, vector<64x32xbf16>
    %c0_3 = arith.constant 0 : index
    %c0_4 = arith.constant 0 : index
    %2 = vector.load %arg2[%c0_3, %c0_4] : memref<32x32xbf16, #tpu.memory_space<vmem>>, vector<32x32xbf16>
    %c0_5 = arith.constant 0 : index
    %c0_6 = arith.constant 0 : index
    %3 = vector.load %arg3[%c0_5, %c0_6] : memref<64x128xf32, #tpu.memory_space<vmem>>, vector<64x128xf32>
    %c0_7 = arith.constant 0 : index
    %c0_8 = arith.constant 0 : index
    %4 = vector.load %arg4[%c0_7, %c0_8] : memref<32x128xf32, #tpu.memory_space<vmem>>, vector<32x128xf32>
    %c0_9 = arith.constant 0 : index
    %c0_10 = arith.constant 0 : index
    %5 = vector.load %arg5[%c0_9, %c0_10] : memref<32x128xf32, #tpu.memory_space<vmem>>, vector<32x128xf32>
    %c0_11 = arith.constant 0 : index
    %c0_12 = arith.constant 0 : index
    %6 = vector.load %arg6[%c0_11, %c0_12] : memref<32x128xf32, #tpu.memory_space<vmem>>, vector<32x128xf32>
    %7 = arith.truncf %5 : vector<32x128xf32> to vector<32x128xbf16>
    %8 = arith.truncf %6 : vector<32x128xf32> to vector<32x128xbf16>
    %cst = arith.constant dense<0.000000e+00> : vector<96x128xf32>
    %9 = tpu.matmul %0, %7, %cst {dimension_numbers = #tpu.dot_dimension_numbers<[1], [0], [0], [1], [0, 0, 1, 1], [], []>} : vector<96x32xbf16>, vector<32x128xbf16>, vector<96x128xf32> -> vector<96x128xf32>
    %10 = vector.extract_strided_slice %9 {offsets = [0, 0], sizes = [64, 128], strides = [1, 1]} : vector<96x128xf32> to vector<64x128xf32>
    %cst_13 = arith.constant dense<0.000000e+00> : vector<64x128xf32>
    %11 = tpu.matmul %1, %8, %cst_13 {dimension_numbers = #tpu.dot_dimension_numbers<[1], [0], [0], [1], [0, 0, 1, 1], [], []>} : vector<64x32xbf16>, vector<32x128xbf16>, vector<64x128xf32> -> vector<64x128xf32>
    %12 = arith.addf %10, %11 : vector<64x128xf32>
    %13 = arith.addf %12, %3 : vector<64x128xf32>
    %14 = vector.extract_strided_slice %13 {offsets = [0, 0], sizes = [32, 128], strides = [1, 1]} : vector<64x128xf32> to vector<32x128xf32>
    %15 = arith.negf %14 : vector<32x128xf32>
    %16 = math.exp %15 : vector<32x128xf32>
    %cst_14 = arith.constant 1.000000e+00 : f32
    %17 = vector.broadcast %cst_14 : f32 to vector<32x128xf32>
    %18 = arith.addf %17, %16 : vector<32x128xf32>
    %19 = arith.divf %17, %18 : vector<32x128xf32>
    %20 = vector.extract_strided_slice %13 {offsets = [32, 0], sizes = [32, 128], strides = [1, 1]} : vector<64x128xf32> to vector<32x128xf32>
    %21 = arith.negf %20 : vector<32x128xf32>
    %22 = math.exp %21 : vector<32x128xf32>
    %cst_15 = arith.constant 1.000000e+00 : f32
    %23 = vector.broadcast %cst_15 : f32 to vector<32x128xf32>
    %24 = arith.addf %23, %22 : vector<32x128xf32>
    %25 = arith.divf %23, %24 : vector<32x128xf32>
    %26 = arith.mulf %25, %6 : vector<32x128xf32>
    %27 = arith.truncf %26 : vector<32x128xf32> to vector<32x128xbf16>
    %28 = vector.extract_strided_slice %9 {offsets = [64, 0], sizes = [32, 128], strides = [1, 1]} : vector<96x128xf32> to vector<32x128xf32>
    %cst_16 = arith.constant dense<0.000000e+00> : vector<32x128xf32>
    %29 = tpu.matmul %2, %27, %cst_16 {dimension_numbers = #tpu.dot_dimension_numbers<[1], [0], [0], [1], [0, 0, 1, 1], [], []>} : vector<32x32xbf16>, vector<32x128xbf16>, vector<32x128xf32> -> vector<32x128xf32>
    %30 = arith.addf %28, %29 : vector<32x128xf32>
    %31 = arith.addf %30, %4 : vector<32x128xf32>
    %32 = math.tanh %31 : vector<32x128xf32>
    %cst_17 = arith.constant 1.000000e+00 : f32
    %33 = vector.broadcast %cst_17 : f32 to vector<32x128xf32>
    %34 = arith.subf %33, %19 : vector<32x128xf32>
    %35 = arith.mulf %34, %6 : vector<32x128xf32>
    %36 = arith.mulf %19, %32 : vector<32x128xf32>
    %37 = arith.addf %35, %36 : vector<32x128xf32>
    %c0_18 = arith.constant 0 : index
    %c0_19 = arith.constant 0 : index
    %38 = vector.load %arg7[%c0_18, %c0_19] : memref<32x128xf32, #tpu.memory_space<vmem>>, vector<32x128xf32>
    tpu.vector_store %arg7[%c0_18, %c0_19], %37 {strides = array<i32>} : memref<32x128xf32, #tpu.memory_space<vmem>>, vector<32x128xf32>,
    return
  }
}

</mosaic_0001>

<bundles_post_ra>
// kernel: tpu_custom_call.1
= control target key start
LH: loop header
LB: loop body
LE: loop exit
PB: predicated region body
PF: predicated region fallthrough
CT: control target
= control target key end

     0   :  { %12 = vsyncpa [#allocation3], 0  ;;  %s956_s0 = inlined_call_operand.vmem [shape: bf16[96,32], index: 0, kind: input, shape index: {}]   ;;  %s957_s1 = inlined_call_operand.vmem [shape: bf16[64,32], index: 1, kind: input, shape index: {}]   ;;  %s958_s2 = inlined_call_operand.hbm [shape: bf16[32,32], index: 2, kind: input, shape index: {}]   ;;  %s959_s3 = inlined_call_operand.vmem [shape: f32[64,128], index: 3, kind: input, shape index: {}]   ;;  %s960_s4 = inlined_call_operand.vmem [shape: f32[32,128], index: 4, kind: input, shape index: {}]   ;;  %s961_s5 = inlined_call_operand.vmem [shape: f32[32,128], index: 5, kind: input, shape index: {}]   ;;  %s962_s6 = inlined_call_operand.hbm [shape: f32[32,128], index: 6, kind: input, shape index: {}]   ;;  %s963_s7 = inlined_call_operand.hbm [shape: f32[32,128], index: 7, kind: output, shape index: {}]  }
   0x1   :  { %13 = vsyncpa [#allocation6], 0 }
   0x2   :  { %14 = vsyncpa [#allocation4], 0  ;;  %s745_s24 = smov [#allocation2]   ;;  %s673_s28 = scalar_lea.hbm %s958_s2, 256 }
   0x3   :  { %s24_s25 = sshll.u32 %s745_s24, 4  ;;  %p674_p0 = scmp.ne.s32.totalorder %s958_s2, %s673_s28  ;;  %s25_s25 = int_to_ptr.vmem [resolvable:$true] %s24_s25 }
   0x4   :  { %p677_p1 = scmp.lt.u32.totalorder %s673_s28, %s958_s2 }
   0x6   :  { %p679_p2 = pnand %p677_p1, %p674_p0 }
   0x8   :  { %682 = shalt.err (!%p679_p2)
}
   0x9   :  { %s683_s10 = scalar_lea.vmem %s25_s25, 256  ;;  %p688_p4 = scmp.lt.s32.totalorder %s25_s25, %s25_s25 }
   0xa   :  { %p684_p3 = scmp.ne.s32.totalorder %s25_s25, %s683_s10  ;;  %p689_p5 = scmp.lt.s32.totalorder %s683_s10, %s683_s10 }
   0xc   :  { %p690_p6 = por %p689_p5, %p688_p4 }
   0xe   :  { %p691_p7 = pnand %p690_p6, %p684_p3 }
  0x10   :  { %694 = shalt.err (!%p691_p7)
}
  0x11   :  { %s746_s11 = smov 64   ;;  %s747_s12 = smov 4  }
  0x12   :  { %30 = dma.hbm_to_vmem [thread:$0]  %s958_s2, 256, %s25_s25, [#allocation3], %s746_s11, %s746_s11, %s747_s12  }
  0x13   :  { %s748_s15 = smov [#allocation5]   ;;  %s695_s19 = scalar_lea.hbm %s962_s6, 512 }
  0x14   :  { %s42_s16 = sshll.u32 %s748_s15, 4  ;;  %p696_p8 = scmp.ne.s32.totalorder %s962_s6, %s695_s19  ;;  %s43_s16 = int_to_ptr.vmem [resolvable:$true] %s42_s16 }
  0x15   :  { %p699_p9 = scmp.lt.u32.totalorder %s695_s19, %s962_s6 }
  0x17   :  { %p701_p10 = pnand %p699_p9, %p696_p8 }
  0x19   :  { %704 = shalt.err (!%p701_p10)
}
  0x1a   :  { %s705_s24 = scalar_lea.vmem %s43_s16, 512  ;;  %p710_p12 = scmp.lt.s32.totalorder %s43_s16, %s43_s16 }
  0x1b   :  { %p706_p11 = scmp.ne.s32.totalorder %s43_s16, %s705_s24  ;;  %p711_p13 = scmp.lt.s32.totalorder %s705_s24, %s705_s24 }
  0x1d   :  { %p712_p0 = por %p711_p13, %p710_p12 }
  0x1f   :  { %p713_p1 = pnand %p712_p0, %p706_p11 }
  0x21   :  { %716 = shalt.err (!%p713_p1)
}
  0x22   :  { %s749_s2 = smov 128   ;;  %s750_s25 = smov 8  }
  0x23   :  { %48 = dma.hbm_to_vmem [thread:$0]  %s962_s6, 512, %s43_s16, [#allocation6], %s749_s2, %s749_s2, %s750_s25  }
  0x24   :  { %739 = dma.done.wait [#allocation3], 256  }
  0x25   :  { %740 = vsyncadd [#allocation3], 4294967040 }
  0x26   :  { %741 = dma.done.wait [#allocation6], 512  }
  0x27   :  { %742 = vsyncadd [#allocation6], 4294966784  ;;  %v92_v0 = vld [vmem:[%s961_s5] sm:$0xff]  ;;  %v93_v1 = vld [vmem:[%s961_s5 + $0x8] sm:$0xff]  ;;  %vm134_vm0 = vcmask 261120  }
  0x28   :  { %v825_v2 = vld [vmem:[#allocation5] sm:$0xff]  ;;  %v100_v3 = vpack.c.bf16 %v93_v1, %v92_v0  ;;  %v827_v4 = vld [vmem:[#allocation5 + $0x8] sm:$0xff]  ;;  %v837_v9 = vld [vmem:[#allocation5 + $0x10] sm:$0xff] }
  0x29   :  { %v94_v5 = vld [vmem:[%s961_s5 + $0x10] sm:$0xff]  ;;  %v95_v6 = vld [vmem:[%s961_s5 + $0x18] sm:$0xff]  ;;  %v102_v7 = vpack.c.bf16 %v827_v4, %v825_v2  ;;  %v839_v10 = vld [vmem:[#allocation5 + $0x18] sm:$0xff] }
  0x2a   :  { %v101_v8 = vpack.c.bf16 %v95_v6, %v94_v5  ;;  %566 = vmatprep.subr.bf16.mxu1 %v100_v3  ;;  %v103_v11 = vpack.c.bf16 %v839_v10, %v837_v9  ;;  %v621_v12 = vld [vmem:[%s956_s0] sm:$0xff]   ;;  %v623_v14 = vld [vmem:[%s956_s0 + $0x8] sm:$0xff]   ;;  %v625_v16 = vld [vmem:[%s956_s0 + $0x10] sm:$0xff]  }
  0x2b   :  { %582 = vmatprep.subr.bf16.mxu0 %v102_v7  ;;  %567 = vmatpush3.bf16.msra.mxu1 %v100_v3  ;;  %v622_v13 = vld [vmem:[%s957_s1] sm:$0xff]   ;;  %v624_v15 = vld [vmem:[%s957_s1 + $0x8] sm:$0xff]   ;;  %v626_v17 = vld [vmem:[%s957_s1 + $0x10] sm:$0xff]  }
  0x2c   :  { %583 = vmatpush3.bf16.msra.mxu0 %v102_v7  ;;  %568 = vmatprep.subr.bf16.mxu1 %v101_v8  ;;  %v627_v18 = vld [vmem:[%s956_s0 + $0x18] sm:$0xff]   ;;  %v629_v20 = vld [vmem:[%s956_s0 + $0x20] sm:$0xff]   ;;  %v631_v21 = vld [vmem:[%s956_s0 + $0x28] sm:$0xff]  }
  0x2d   :  { %584 = vmatprep.subr.bf16.mxu0 %v103_v11  ;;  %570 = vmatprep.mubr.msk.bf16.mxu1 %vm134_vm0, %v621_v12  ;;  %v628_v19 = vld [vmem:[%s957_s1 + $0x18] sm:$0xff]   ;;  %v630_v22 = vld [vmem:[#allocation2] sm:$0xff]   ;;  %v86_v36 = vld [vmem:[%s959_s3 + $0x30] sm:$0xff] }
  0x2e   :  { %586 = vmatprep.mubr.msk.bf16.mxu0 %vm134_vm0, %v622_v13  ;;  %v84_v40 = vld [vmem:[%s959_s3 + $0x20] sm:$0xff]  ;;  %v87_v44 = vld [vmem:[%s959_s3 + $0x38] sm:$0xff]  ;;  %v85_v49 = vld [vmem:[%s959_s3 + $0x28] sm:$0xff] }
  0x2f   :  { %569 = vmatpush3.bf16.msra.mxu1 %v101_v8 }
  0x30   :  { %585 = vmatpush3.bf16.msra.mxu0 %v103_v11 }
  0x32   :  { %571 = vmatmul.mubr.msk.bf16.vlgmr.msra.gmra.mrb[0].mxu1 %vm134_vm0, %v623_v14 }
  0x33   :  { %587 = vmatmul.mubr.msk.bf16.vlgmr.msra.gmra.mrb[0].mxu0 %vm134_vm0, %v624_v15  ;;  %574 = vmatprep.mubr.msk.bf16.mxu1 %vm134_vm0, %v625_v16 }
  0x34   :  { %590 = vmatprep.mubr.msk.bf16.mxu0 %vm134_vm0, %v626_v17  ;;  %v632_v17 = vld [vmem:[#allocation2 + $0x8] sm:$0xff]  }
  0x3a   :  { %575 = vmatmul.mubr.msk.bf16.gmra.mrb[4].mxu1 %vm134_vm0, %v627_v18 }
  0x3b   :  { %591 = vmatmul.mubr.msk.bf16.gmra.mrb[4].mxu0 %vm134_vm0, %v628_v19  ;;  %578 = vmatprep.mubr.msk.bf16.mxu1 %vm134_vm0, %v629_v20 }
  0x3c   :  { %598 = vmatprep.mubr.msk.bf16.mxu0 %vm134_vm0, %v630_v22  ;;  %v82_v22 = vld [vmem:[%s959_s3 + $0x10] sm:$0xff] }
  0x42   :  { %579 = vmatmul.mubr.msk.bf16.gmra.mrb[8].mxu1 %vm134_vm0, %v631_v21 }
 0x105   :  { %v572_v23 = vpop.f32.mrb[0].mxu1 }
 0x106   :  { %v588_v24 = vpop.f32.mrb[0].mxu0  ;;  %v187_v25 = vpop.f32.mrb[1].mxu1 }
 0x107   :  { %v884_v26 = vadd.f32 %v588_v24, %v572_v23  ;;  %v300_v27 = vpop.f32.mrb[1].mxu0  ;;  %v573_v28 = vpop.f32.mrb[2].mxu1  ;;  %v80_v23 = vld [vmem:[%s959_s3] sm:$0xff]  ;;  %v83_v24 = vld [vmem:[%s959_s3 + $0x18] sm:$0xff] }
 0x108   :  { %v886_v29 = vadd.f32 %v300_v27, %v187_v25  ;;  %v589_v30 = vpop.f32.mrb[2].mxu0  ;;  %v190_v31 = vpop.f32.mrb[3].mxu1  ;;  %v81_v27 = vld [vmem:[%s959_s3 + $0x8] sm:$0xff] }
 0x109   :  { %v888_v32 = vadd.f32 %v589_v30, %v573_v28  ;;  %v303_v33 = vpop.f32.mrb[3].mxu0  ;;  %v341_v25 = vadd.f32 %v884_v26, %v82_v22 }
 0x10a   :  { %v890_v34 = vadd.f32 %v303_v33, %v190_v31  ;;  %v339_v28 = vadd.f32 %v886_v29, %v80_v23 }
 0x10b   :  { %v342_v30 = vadd.f32 %v888_v32, %v83_v24  ;;  %v538_v33 = vmul.f32 -1.442695, %v341_v25  ;;  %v90_v32 = vld [vmem:[%s960_s4 + $0x10] sm:$0xff] }
 0x10c   :  { %v340_v31 = vadd.f32 %v890_v34, %v81_v27 }
 0x10d   :  { %v576_v35 = vpop.f32.mrb[4].mxu1 }
 0x10e   :  { %v592_v37 = vpop.f32.mrb[4].mxu0  ;;  %v203_v38 = vpop.f32.mrb[5].mxu1 }
 0x10f   :  { %v337_v39 = vadd.f32 %v592_v37, %v576_v35  ;;  %v316_v41 = vpop.f32.mrb[5].mxu0  ;;  %v577_v42 = vpop.f32.mrb[6].mxu1  ;;  %v536_v35 = vmul.f32 -1.442695, %v339_v28  ;;  %v537_v37 = vmul.f32 -1.442695, %v340_v31 }
 0x110   :  { %v335_v43 = vadd.f32 %v316_v41, %v203_v38  ;;  %v593_v45 = vpop.f32.mrb[6].mxu0  ;;  %v206_v46 = vpop.f32.mrb[7].mxu1 }
 0x111   :  { %v345_v47 = vadd.f32 %v337_v39, %v86_v36  ;;  %v338_v48 = vadd.f32 %v593_v45, %v577_v42  ;;  %v319_v50 = vpop.f32.mrb[7].mxu0  ;;  %v539_v36 = vmul.f32 -1.442695, %v342_v30  ;;  %v88_v45 = vld [vmem:[%s960_s4] sm:$0xff] }
 0x112   :  { %v343_v51 = vadd.f32 %v335_v43, %v84_v40  ;;  %v336_v52 = vadd.f32 %v319_v50, %v206_v46 }
 0x113   :  { %v542_v53 = vmul.f32 -1.442695, %v345_v47  ;;  %v346_v54 = vadd.f32 %v338_v48, %v87_v44  ;;  %v91_v48 = vld [vmem:[%s960_s4 + $0x18] sm:$0xff] }
 0x114   :  { %v540_v55 = vmul.f32 -1.442695, %v343_v51  ;;  %v344_v56 = vadd.f32 %v336_v52, %v85_v49  ;;  %v89_v52 = vld [vmem:[%s960_s4 + $0x8] sm:$0xff]  ;;  %s751_s4 = smov [#allocation7]  }
 0x115   :  { %633 = vpow2.f32 %v542_v53  ;;  %v543_v57 = vmul.f32 -1.442695, %v346_v54  ;;  %v580_v18 = vpop.f32.mrb[8].mxu1  ;;  %s503_s29 = sshll.u32 %s751_s4, 4  ;;  %s504_s29 = int_to_ptr.vmem [resolvable:$true] %s503_s29 }
 0x116   :  { %635 = vpow2.f32 %v540_v55  ;;  %v541_v58 = vmul.f32 -1.442695, %v344_v56  ;;  %v219_v19 = vpop.f32.mrb[9].mxu1  ;;  %s717_s30 = scalar_lea.vmem %s504_s29, 512  ;;  %p722_p3 = scmp.lt.s32.totalorder %s504_s29, %s504_s29 }
 0x117   :  { %637 = vpow2.f32 %v543_v57  ;;  %v581_v20 = vpop.f32.mrb[10].mxu1  ;;  %p718_p2 = scmp.ne.s32.totalorder %s504_s29, %s717_s30  ;;  %p723_p4 = scmp.lt.s32.totalorder %s717_s30, %s717_s30 }
 0x118   :  { %639 = vpow2.f32 %v541_v58  ;;  %v222_v21 = vpop.f32.mrb[11].mxu1 }
 0x119   :  { %p724_p5 = por %p723_p4, %p722_p3 }
 0x11b   :  { %p725_p6 = pnand %p724_p5, %p718_p2 }
 0x11f   :  { %v634_v59 = vpop.eup %633 }
 0x120   :  { %v636_v60 = vpop.eup %635  ;;  %v385_v61 = vadd.f32 1.0, %v634_v59 }
 0x121   :  { %v638_v62 = vpop.eup %637  ;;  %v383_v63 = vadd.f32 1.0, %v636_v60 }
 0x122   :  { %v640_v0 = vpop.eup %639  ;;  %641 = vrcp.f32 %v385_v61  ;;  %v386_v1 = vadd.f32 1.0, %v638_v62 }
 0x123   :  { %643 = vrcp.f32 %v383_v63  ;;  %v384_v3 = vadd.f32 1.0, %v640_v0 }
 0x124   :  { %645 = vrcp.f32 %v386_v1 }
 0x125   :  { %647 = vrcp.f32 %v384_v3 }
 0x126   :  { %649 = vpow2.f32 %v538_v33 }
 0x127   :  { %651 = vpow2.f32 %v536_v35 }
 0x128   :  { %653 = vpow2.f32 %v539_v36 }
 0x129   :  { %655 = vpow2.f32 %v537_v37 }
 0x12c   :  { %v642_v5 = vpop.eup %641 }
 0x12d   :  { %v644_v6 = vpop.eup %643  ;;  %v397_v11 = vmul.f32 %v642_v5, %v837_v9 }
 0x12e   :  { %v646_v7 = vpop.eup %645  ;;  %v395_v13 = vmul.f32 %v644_v6, %v825_v2 }
 0x12f   :  { %v648_v8 = vpop.eup %647  ;;  %v398_v12 = vmul.f32 %v646_v7, %v839_v10 }
 0x130   :  { %v396_v14 = vmul.f32 %v648_v8, %v827_v4  ;;  %v650_v38 = vpop.eup %649 }
 0x131   :  { %v400_v15 = vpack.c.bf16 %v398_v12, %v397_v11  ;;  %v652_v26 = vpop.eup %651  ;;  %v361_v41 = vadd.f32 1.0, %v650_v38 }
 0x132   :  { %v399_v16 = vpack.c.bf16 %v396_v14, %v395_v13  ;;  %v654_v39 = vpop.eup %653  ;;  %v359_v42 = vadd.f32 1.0, %v652_v26 }
 0x133   :  { %v656_v40 = vpop.eup %655  ;;  %v362_v43 = vadd.f32 1.0, %v654_v39  ;;  %657 = vrcp.f32 %v361_v41 }
 0x134   :  { %594 = vmatprep.subr.bf16.mxu0 %v399_v16  ;;  %v360_v29 = vadd.f32 1.0, %v656_v40  ;;  %659 = vrcp.f32 %v359_v42 }
 0x135   :  { %595 = vmatpush3.bf16.msra.mxu0 %v399_v16  ;;  %661 = vrcp.f32 %v362_v43 }
 0x136   :  { %596 = vmatprep.subr.bf16.mxu0 %v400_v15  ;;  %663 = vrcp.f32 %v360_v29 }
 0x139   :  { %597 = vmatpush3.bf16.msra.mxu0 %v400_v15 }
 0x13c   :  { %599 = vmatmul.mubr.msk.bf16.vlgmr.msra.gmra.mrb[8].mxu0 %vm134_vm0, %v632_v17 }
 0x13d   :  { %v658_v58 = vpop.eup %657 }
 0x13e   :  { %v660_v59 = vpop.eup %659  ;;  %v480_v62 = vsub.f32 1.0, %v658_v58 }
 0x13f   :  { %v662_v60 = vpop.eup %661  ;;  %v478_v63 = vsub.f32 1.0, %v660_v59 }
 0x140   :  { %v664_v61 = vpop.eup %663  ;;  %v481_v0 = vsub.f32 1.0, %v662_v60  ;;  %v484_v6 = vmul.f32 %v480_v62, %v837_v9 }
 0x141   :  { %v479_v3 = vsub.f32 1.0, %v664_v61  ;;  %v482_v11 = vmul.f32 %v478_v63, %v825_v2 }
 0x142   :  { %v485_v14 = vmul.f32 %v481_v0, %v839_v10 }
 0x143   :  { %v483_v17 = vmul.f32 %v479_v3, %v827_v4 }
 0x20f   :  { %v600_v34 = vpop.f32.mrb[8].mxu0 }
 0x210   :  { %v468_v44 = vadd.f32 %v600_v34, %v580_v18  ;;  %v451_v46 = vpop.f32.mrb[9].mxu0 }
 0x211   :  { %v466_v47 = vadd.f32 %v451_v46, %v219_v19  ;;  %v601_v49 = vpop.f32.mrb[10].mxu0 }
 0x212   :  { %v472_v50 = vadd.f32 %v468_v44, %v90_v32  ;;  %v469_v51 = vadd.f32 %v601_v49, %v581_v20  ;;  %v454_v53 = vpop.f32.mrb[11].mxu0 }
 0x213   :  { %v470_v54 = vadd.f32 %v466_v47, %v88_v45  ;;  %v467_v55 = vadd.f32 %v454_v53, %v222_v21 }
 0x214   :  { %665 = vtanh.f32 %v472_v50  ;;  %v473_v56 = vadd.f32 %v469_v51, %v91_v48 }
 0x215   :  { %667 = vtanh.f32 %v470_v54  ;;  %v471_v57 = vadd.f32 %v467_v55, %v89_v52 }
 0x216   :  { %669 = vtanh.f32 %v473_v56 }
 0x217   :  { %671 = vtanh.f32 %v471_v57 }
 0x21e   :  { %v666_v1 = vpop.eup %665 }
 0x21f   :  { %v668_v5 = vpop.eup %667  ;;  %v488_v7 = vmul.f32 %v666_v1, %v658_v58 }
 0x220   :  { %v670_v8 = vpop.eup %669  ;;  %v486_v12 = vmul.f32 %v668_v5, %v660_v59 }
 0x221   :  { %v672_v13 = vpop.eup %671  ;;  %v489_v15 = vmul.f32 %v670_v8, %v662_v60  ;;  %v492_v16 = vadd.f32 %v488_v7, %v484_v6 }
 0x222   :  { %v487_v18 = vmul.f32 %v672_v13, %v664_v61  ;;  %v490_v19 = vadd.f32 %v486_v12, %v482_v11 }
 0x223   :  { %v493_v20 = vadd.f32 %v489_v15, %v485_v14  ;;  %496 = vst [vmem:[#allocation7 + $0x10] sm:$0xff] %v492_v16 }
 0x224   :  { %v491_v21 = vadd.f32 %v487_v18, %v483_v17  ;;  %494 = vst [vmem:[#allocation7] sm:$0xff] %v490_v19 }
 0x225   :  { %497 = vst [vmem:[#allocation7 + $0x18] sm:$0xff] %v493_v20 }
 0x226   :  { %495 = vst [vmem:[#allocation7 + $0x8] sm:$0xff] %v491_v21 }
 0x227   :  { %728 = shalt.err (!%p725_p6)
}
 0x228   :  { %s729_s1 = scalar_lea.hbm %s963_s7, 512 }
 0x229   :  { %p730_p7 = scmp.ne.s32.totalorder %s963_s7, %s729_s1  ;;  %p733_p8 = scmp.lt.u32.totalorder %s729_s1, %s963_s7 }
 0x22b   :  { %p735_p9 = pnand %p733_p8, %p730_p7 }
 0x22d   :  { %738 = shalt.err (!%p735_p9)
}
 0x22e   :  { %509 = dma.vmem_to_hbm [thread:$0]  %s504_s29, 512, %s963_s7, [#allocation4], %s749_s2, %s749_s2, %s750_s25  }
 0x22f   :  { %743 = dma.done.wait [#allocation4], 512  }
 0x230   :  { %744 = vsyncadd [#allocation4], 4294966784 }
 0x231   :  { %513 = vsyncpa [#allocation3], 1 }
 0x232   :  { %514 = vsyncpa [#allocation6], 1 }
 0x233   :  { %515 = vsyncpa [#allocation4], 1 }

</bundles_post_ra>
